<compile_context>
chip_gen: v5e
topology: v5e:2x2
jax: 0.10.0
libtpu: 0.0.40
codegen_flags: <defaults>
</compile_context>

<pallas_src>
import functools

import jax
import jax.numpy as jnp
from jax.experimental import pallas as pl
from jax.experimental.pallas import tpu as pltpu

LANE = 128
BF16_SUBLANE_PACK = 16  # bf16 vregs hold (16, 128)


def _round_up(x, m):
    return (x + m - 1) // m * m


def inverse_model_kernel(s_ref, ns_ref, w1a_ref, w1b_ref, b1_ref,
                         w2_ref, b2_ref, o_ref):
    # Inputs arrive as f32 tiles; cast to bf16 in-register just before the MXU.
    compute_dtype = w1a_ref.dtype
    s = s_ref[...].astype(compute_dtype)
    ns = ns_ref[...].astype(compute_dtype)

    # hidden = relu([s, ns] @ W1 + b1) == relu(s @ W1a + ns @ W1b + b1)
    h = jnp.dot(s, w1a_ref[...], preferred_element_type=jnp.float32)
    h = h + jnp.dot(ns, w1b_ref[...], preferred_element_type=jnp.float32)
    h = jnp.maximum(h + b1_ref[...], 0.0)                 # (B, H) f32

    # logits = hidden @ W2 + b2   (W2 lane-padded to 128 columns)
    logits = jnp.dot(h.astype(w2_ref.dtype), w2_ref[...],
                     preferred_element_type=jnp.float32)
    o_ref[...] = (logits + b2_ref[...]).astype(o_ref.dtype)


def prepare_params(params, compute_dtype=jnp.bfloat16):
    """Cast matmul weights to bf16 and lane-pad the output projection to 128."""
    w1a, w1b, b1, w2, b2 = params
    num_actions = w2.shape[1]
    a_pad = _round_up(num_actions, LANE)
    w2p = jnp.pad(w2, ((0, 0), (0, a_pad - num_actions)))
    b2p = jnp.pad(b2, ((0, 0), (0, a_pad - num_actions)))
    kernel_params = (w1a.astype(compute_dtype),
                     w1b.astype(compute_dtype),
                     b1.astype(jnp.float32),
                     w2p.astype(compute_dtype),
                     b2p.astype(jnp.float32))
    return kernel_params, num_actions


@functools.partial(jax.jit, static_argnums=(3, 4))
def inverse_model_forward(state_features, next_state_features, kernel_params,
                          num_actions, tile_b=1024):
    """Pallas implementation of InverseModel.forward."""
    w1a, w1b, b1, w2, b2 = kernel_params
    B, F = state_features.shape
    H = w1a.shape[1]
    A_pad = w2.shape[1]
    out_dtype = jnp.bfloat16

    # Keep activations in their HBM dtype (f32); the kernel casts in vregs.
    s = state_features.astype(jnp.float32)
    ns = next_state_features.astype(jnp.float32)

    if B <= tile_b:
        # Single invocation, whole arrays resident in VMEM, no grid scaffolding.
        # Pad rows to a multiple of 16 (bf16 sublane packing for the MXU LHS).
        b_pad = _round_up(max(B, BF16_SUBLANE_PACK), BF16_SUBLANE_PACK)
        if b_pad != B:
            s = jnp.pad(s, ((0, b_pad - B), (0, 0)))
            ns = jnp.pad(ns, ((0, b_pad - B), (0, 0)))
        vmem = pl.BlockSpec(memory_space=pltpu.MemorySpace.VMEM)
        out = pl.pallas_call(
            inverse_model_kernel,
            out_shape=jax.ShapeDtypeStruct((b_pad, A_pad), out_dtype),
            in_specs=[vmem] * 7,
            out_specs=vmem,
        )(s, ns, w1a, w1b, b1, w2, b2)
    else:
        # Batch-tiled grid: weight index_maps are constant so the weights stay
        # resident in VMEM across grid steps; batch axis sharded across cores.
        # No wrapper-side padding: cdiv grid + masked partial last block.
        grid_len = pl.cdiv(B, tile_b)
        const = lambda shape: pl.BlockSpec(shape, lambda i: (0, 0))
        flops = 2 * B * (2 * F * H + H * A_pad)
        bytes_accessed = (2 * B * F * 4                    # f32 activations in
                          + B * A_pad * 2                  # bf16 logits out
                          + (w1a.size + w1b.size + w2.size) * 2
                          + (b1.size + b2.size) * 4)
        out = pl.pallas_call(
            inverse_model_kernel,
            out_shape=jax.ShapeDtypeStruct((B, A_pad), out_dtype),
            grid=(grid_len,),
            in_specs=[
                pl.BlockSpec((tile_b, F), lambda i: (i, 0)),
                pl.BlockSpec((tile_b, F), lambda i: (i, 0)),
                const(w1a.shape),
                const(w1b.shape),
                const(b1.shape),
                const(w2.shape),
                const(b2.shape),
            ],
            out_specs=pl.BlockSpec((tile_b, A_pad), lambda i: (i, 0)),
            compiler_params=pltpu.CompilerParams(
                dimension_semantics=("parallel",),
                vmem_limit_bytes=32 * 1024 * 1024),
            cost_estimate=pl.CostEstimate(
                flops=flops, transcendentals=0, bytes_accessed=bytes_accessed),
        )(s, ns, w1a, w1b, b1, w2, b2)

    # Slice off lane/row padding; upcast the tiny result slab back to f32.
    return out[:B, :num_actions].astype(jnp.float32)


def init_params(key, feature_dim=288, num_actions=18, hidden_dim=256):
    """Deterministic synthetic params, PyTorch-Linear-style uniform init (f32)."""
    k1, k2, k3, k4 = jax.random.split(key, 4)
    fan_in1 = feature_dim * 2
    bound1 = 1.0 / jnp.sqrt(fan_in1)
    w1 = jax.random.uniform(k1, (fan_in1, hidden_dim), jnp.float32,
                            minval=-bound1, maxval=bound1)
    b1 = jax.random.uniform(k2, (1, hidden_dim), jnp.float32,
                            minval=-bound1, maxval=bound1)
    bound2 = 1.0 / jnp.sqrt(hidden_dim)
    w2 = jax.random.uniform(k3, (hidden_dim, num_actions), jnp.float32,
                            minval=-bound2, maxval=bound2)
    b2 = jax.random.uniform(k4, (1, num_actions), jnp.float32,
                            minval=-bound2, maxval=bound2)
    w1a = w1[:feature_dim]
    w1b = w1[feature_dim:]
    return (w1a, w1b, b1, w2, b2)


def reference_forward(state_features, next_state_features, params):
    """Pure-JAX f32 reference matching the PyTorch forward semantics."""
    w1a, w1b, b1, w2, b2 = params
    w1 = jnp.concatenate([w1a, w1b], axis=0)
    combined = jnp.concatenate([state_features, next_state_features], axis=1)
    h = jnp.maximum(combined @ w1 + b1, 0.0)
    return h @ w2 + b2


def reference_forward_bf16(state_features, next_state_features, params):
    """Pure-JAX reference mirroring the kernel's bf16-operand / f32-acc math
    (including the bf16 rounding of the stored logits)."""
    w1a, w1b, b1, w2, b2 = params
    bf = jnp.bfloat16
    h = jnp.dot(state_features.astype(bf), w1a.astype(bf),
                preferred_element_type=jnp.float32)
    h = h + jnp.dot(next_state_features.astype(bf), w1b.astype(bf),
                    preferred_element_type=jnp.float32)
    h = jnp.maximum(h + b1, 0.0)
    logits = jnp.dot(h.astype(bf), w2.astype(bf),
                     preferred_element_type=jnp.float32) + b2
    return logits.astype(bf).astype(jnp.float32)


if __name__ == "__main__":
    feature_dim, num_actions, hidden_dim = 288, 18, 256
    batch = 8

    key = jax.random.PRNGKey(0)
    k_s, k_ns, k_p = jax.random.split(key, 3)
    state_features = jax.random.normal(k_s, (batch, feature_dim), jnp.float32)
    next_state_features = jax.random.normal(k_ns, (batch, feature_dim), jnp.float32)
    params = init_params(k_p, feature_dim, num_actions, hidden_dim)
    kernel_params, _ = prepare_params(params)

    # --- small batch: single-invocation (no-grid) path ---
    out = inverse_model_forward(state_features, next_state_features,
                                kernel_params, num_actions)
    out = jax.block_until_ready(out)
    assert out.shape == (batch, num_actions)

    ref_bf16 = reference_forward_bf16(state_features, next_state_features, params)
    ref_f32 = reference_forward(state_features, next_state_features, params)
    assert jnp.allclose(out, ref_bf16, atol=1e-2, rtol=1e-2), "mismatch vs bf16 ref"
    assert jnp.allclose(out, ref_f32, atol=5e-2, rtol=5e-2), "mismatch vs f32 ref"

    # --- large batch: batch-tiled grid path, B NOT a tile multiple (exercises
    #     the padding-free cdiv grid with a masked partial last block) ---
    big_b = 1200
    kb_s, kb_ns = jax.random.split(jax.random.PRNGKey(1))
    s_big = jax.random.normal(kb_s, (big_b, feature_dim), jnp.float32)
    ns_big = jax.random.normal(kb_ns, (big_b, feature_dim), jnp.float32)
    out_big = jax.block_until_ready(
        inverse_model_forward(s_big, ns_big, kernel_params, num_actions))
    assert out_big.shape == (big_b, num_actions)
    ref_big = reference_forward_bf16(s_big, ns_big, params)
    assert jnp.allclose(out_big, ref_big, atol=1e-2, rtol=1e-2), "mismatch (tiled)"

    print("KERNEL_OK")
</pallas_src>

<mosaic_0001>
module attributes {stable_mosaic.version = 11 : i64} {
  func.func @inverse_model_kernel(%arg0: memref<16x288xf32, #tpu.memory_space<vmem>>, %arg1: memref<16x288xf32, #tpu.memory_space<vmem>>, %arg2: memref<288x256xbf16, #tpu.memory_space<vmem>>, %arg3: memref<288x256xbf16, #tpu.memory_space<vmem>>, %arg4: memref<1x256xf32, #tpu.memory_space<vmem>>, %arg5: memref<256x128xbf16, #tpu.memory_space<vmem>>, %arg6: memref<1x128xf32, #tpu.memory_space<vmem>>, %arg7: memref<16x128xbf16, #tpu.memory_space<vmem>>) attributes {dimension_semantics = [], scalar_prefetch = 0 : i64, scratch_operands = 0 : i64, tpu.core_type = #tpu.core_type<tc>} {
    %c0 = arith.constant 0 : index
    %c0_0 = arith.constant 0 : index
    %0 = vector.load %arg0[%c0, %c0_0] : memref<16x288xf32, #tpu.memory_space<vmem>>, vector<16x288xf32>
    %1 = arith.truncf %0 : vector<16x288xf32> to vector<16x288xbf16>
    %c0_1 = arith.constant 0 : index
    %c0_2 = arith.constant 0 : index
    %2 = vector.load %arg1[%c0_1, %c0_2] : memref<16x288xf32, #tpu.memory_space<vmem>>, vector<16x288xf32>
    %3 = arith.truncf %2 : vector<16x288xf32> to vector<16x288xbf16>
    %c0_3 = arith.constant 0 : index
    %c0_4 = arith.constant 0 : index
    %4 = vector.load %arg2[%c0_3, %c0_4] : memref<288x256xbf16, #tpu.memory_space<vmem>>, vector<288x256xbf16>
    %cst = arith.constant dense<0.000000e+00> : vector<16x256xf32>
    %5 = tpu.matmul %1, %4, %cst {dimension_numbers = #tpu.dot_dimension_numbers<[1], [0], [0], [1], [0, 0, 1, 1], [], []>} : vector<16x288xbf16>, vector<288x256xbf16>, vector<16x256xf32> -> vector<16x256xf32>
    %c0_5 = arith.constant 0 : index
    %c0_6 = arith.constant 0 : index
    %6 = vector.load %arg3[%c0_5, %c0_6] : memref<288x256xbf16, #tpu.memory_space<vmem>>, vector<288x256xbf16>
    %cst_7 = arith.constant dense<0.000000e+00> : vector<16x256xf32>
    %7 = tpu.matmul %3, %6, %cst_7 {dimension_numbers = #tpu.dot_dimension_numbers<[1], [0], [0], [1], [0, 0, 1, 1], [], []>} : vector<16x288xbf16>, vector<288x256xbf16>, vector<16x256xf32> -> vector<16x256xf32>
    %8 = arith.addf %5, %7 : vector<16x256xf32>
    %c0_8 = arith.constant 0 : index
    %c0_9 = arith.constant 0 : index
    %9 = vector.load %arg4[%c0_8, %c0_9] : memref<1x256xf32, #tpu.memory_space<vmem>>, vector<1x256xf32>
    %10 = vector.broadcast %9 : vector<1x256xf32> to vector<16x256xf32>
    %11 = arith.addf %8, %10 : vector<16x256xf32>
    %cst_10 = arith.constant 0.000000e+00 : f32
    %12 = vector.broadcast %cst_10 : f32 to vector<16x256xf32>
    %13 = arith.maximumf %11, %12 : vector<16x256xf32>
    %14 = arith.truncf %13 : vector<16x256xf32> to vector<16x256xbf16>
    %c0_11 = arith.constant 0 : index
    %c0_12 = arith.constant 0 : index
    %15 = vector.load %arg5[%c0_11, %c0_12] : memref<256x128xbf16, #tpu.memory_space<vmem>>, vector<256x128xbf16>
    %cst_13 = arith.constant dense<0.000000e+00> : vector<16x128xf32>
    %16 = tpu.matmul %14, %15, %cst_13 {dimension_numbers = #tpu.dot_dimension_numbers<[1], [0], [0], [1], [0, 0, 1, 1], [], []>} : vector<16x256xbf16>, vector<256x128xbf16>, vector<16x128xf32> -> vector<16x128xf32>
    %c0_14 = arith.constant 0 : index
    %c0_15 = arith.constant 0 : index
    %17 = vector.load %arg6[%c0_14, %c0_15] : memref<1x128xf32, #tpu.memory_space<vmem>>, vector<1x128xf32>
    %18 = vector.broadcast %17 : vector<1x128xf32> to vector<16x128xf32>
    %19 = arith.addf %16, %18 : vector<16x128xf32>
    %20 = arith.truncf %19 : vector<16x128xf32> to vector<16x128xbf16>
    %c0_16 = arith.constant 0 : index
    %c0_17 = arith.constant 0 : index
    %21 = vector.load %arg7[%c0_16, %c0_17] : memref<16x128xbf16, #tpu.memory_space<vmem>>, vector<16x128xbf16>
    tpu.vector_store %arg7[%c0_16, %c0_17], %20 {strides = array<i32>} : memref<16x128xbf16, #tpu.memory_space<vmem>>, vector<16x128xbf16>,
    return
  }
}

</mosaic_0001>

<bundles_post_ra>
// kernel: inverse_model_forward.1
= control target key start
LH: loop header
LB: loop body
LE: loop exit
PB: predicated region body
PF: predicated region fallthrough
CT: control target
= control target key end

     0   :  { %12 = vsyncpa [#allocation3], 0  ;;  %s1527_s0 = inlined_call_operand.vmem [shape: f32[16,288], index: 0, kind: input, shape index: {}]   ;;  %s1528_s1 = inlined_call_operand.vmem [shape: f32[16,288], index: 1, kind: input, shape index: {}]   ;;  %s1529_s2 = inlined_call_operand.hbm [shape: bf16[288,256], index: 2, kind: input, shape index: {}]   ;;  %s1530_s3 = inlined_call_operand.hbm [shape: bf16[288,256], index: 3, kind: input, shape index: {}]   ;;  %s1531_s4 = inlined_call_operand.vmem [shape: f32[1,256], index: 4, kind: input, shape index: {}]   ;;  %s1532_s5 = inlined_call_operand.hbm [shape: bf16[256,128], index: 5, kind: input, shape index: {}]   ;;  %s1533_s6 = inlined_call_operand.vmem [shape: f32[1,128], index: 6, kind: input, shape index: {}]   ;;  %s1534_s7 = inlined_call_operand.vmem [shape: bf16[16,128], index: 7, kind: output, shape index: {}]  }
   0x1   :  { %13 = vsyncpa [#allocation5], 0  ;;  %s35_s26 = sshll.u32 %s1530_s3, 4  ;;  %s1418_s27 = smov [#allocation4]   ;;  %s36_s26 = int_to_ptr.hbm [resolvable:$true] %s35_s26 }
   0x2   :  { %s37_s28 = sshll.u32 %s1418_s27, 4  ;;  %s22_s8 = sshll.u32 %s1529_s2, 4  ;;  %s38_s28 = int_to_ptr.vmem [resolvable:$true] %s37_s28  ;;  %s23_s8 = int_to_ptr.hbm [resolvable:$true] %s22_s8 }
   0x3   :  { %s1419_s9 = smov 128   ;;  %s1420_s10 = smov 8  }
   0x4   :  { %43 = dma.hbm_to_vmem [thread:$0]  %s36_s26, 4608, %s38_s28, [#allocation5], %s1419_s9, %s1419_s9, %s1420_s10  }
   0x5   :  { %s1421_s11 = smov [#allocation2]   ;;  %s50_s15 = sshll.u32 %s1532_s5, 4  ;;  %s51_s15 = int_to_ptr.hbm [resolvable:$true] %s50_s15 }
   0x6   :  { %s24_s12 = sshll.u32 %s1421_s11, 4  ;;  %s1422_s3 = smov [#allocation6]   ;;  %s25_s12 = int_to_ptr.vmem [resolvable:$true] %s24_s12 }
   0x7   :  { %30 = dma.hbm_to_vmem [thread:$0]  %s23_s8, 4608, %s25_s12, [#allocation3], %s1419_s9, %s1419_s9, %s1420_s10  }
   0x8   :  { %s52_s16 = sshll.u32 %s1422_s3, 4  ;;  %s1423_s17 = smov 64   ;;  %s53_s16 = int_to_ptr.vmem [resolvable:$true] %s52_s16 }
   0x9   :  { %s1424_s18 = smov 4  }
   0xa   :  { %58 = dma.hbm_to_vmem [thread:$0]  %s51_s15, 2048, %s53_s16, [#allocation5], %s1423_s17, %s1423_s17, %s1424_s18  }
   0xb   :  { %1414 = dma.done.wait [#allocation3], 4608  }
   0xc   :  { %1415 = vsyncadd [#allocation3], 4294962688 }
   0xd   :  { %1416 = dma.done.wait [#allocation5], 6656  }
   0xe   :  { %1417 = vsyncadd [#allocation5], 4294960640  ;;  %v943_v0 = vld [vmem:[#allocation4 + $0x70] sm:$0xf]  ;;  %v1292_v1 = vld [vmem:[#allocation4 + $0x74] sm:$0xf0] }
   0xf   :  { %v1007_v2 = vld [vmem:[#allocation4 + $0xf0] sm:$0xf]  ;;  %v944_v3 = vor.u32 %v1292_v1, %v943_v0  ;;  %v1308_v4 = vld [vmem:[#allocation4 + $0xf4] sm:$0xf0]  ;;  %v1291_v9 = vld [vmem:[#allocation4 + $0x74] sm:$0xf] }
  0x10   :  { %v1023_v5 = vld [vmem:[#allocation4 + $0x110] sm:$0xf]  ;;  %v1312_v6 = vld [vmem:[#allocation4 + $0x114] sm:$0xf0]  ;;  %v1008_v7 = vor.u32 %v1308_v4, %v1007_v2  ;;  %v945_v10 = vld [vmem:[#allocation4 + $0x78] sm:$0xf0] }
  0x11   :  { %v1024_v8 = vor.u32 %v1312_v6, %v1023_v5  ;;  %v935_v11 = vld [vmem:[#allocation4 + $0x60] sm:$0xf]  ;;  %348 = vmatpush.bf16.msra.mxu0 %v944_v3  ;;  %v948_v12 = vor.u32 %v1291_v9, %v945_v10  ;;  %v1290_v13 = vld [vmem:[#allocation4 + $0x64] sm:$0xf0]  ;;  %v1289_v20 = vld [vmem:[#allocation4 + $0x64] sm:$0xf] }
  0x12   :  { %v999_v14 = vld [vmem:[#allocation4 + $0xe0] sm:$0xf]  ;;  %v1306_v15 = vld [vmem:[#allocation4 + $0xe4] sm:$0xf0]  ;;  %362 = vmatpush.bf16.msra.mxu1 %v1008_v7  ;;  %v936_v16 = vor.u32 %v1290_v13, %v935_v11  ;;  %v937_v22 = vld [vmem:[#allocation4 + $0x68] sm:$0xf0] }
  0x13   :  { %382 = vmatpush.bf16.msra.mxu2 %v1024_v8  ;;  %v1000_v17 = vor.u32 %v1306_v15, %v999_v14  ;;  %v1015_v18 = vld [vmem:[#allocation4 + $0x100] sm:$0xf]  ;;  %v1310_v19 = vld [vmem:[#allocation4 + $0x104] sm:$0xf0]  ;;  %390 = vmatpush.bf16.msra.mxu3 %v948_v12  ;;  %v1307_v23 = vld [vmem:[#allocation4 + $0xf4] sm:$0xf]  ;;  %v940_v25 = vor.u32 %v1289_v20, %v937_v22 }
  0x14   :  { %v1016_v21 = vor.u32 %v1310_v19, %v1015_v18  ;;  %v1009_v24 = vld [vmem:[#allocation4 + $0xf8] sm:$0xf0]  ;;  %v927_v27 = vld [vmem:[#allocation4 + $0x50] sm:$0xf]  ;;  %v1288_v28 = vld [vmem:[#allocation4 + $0x54] sm:$0xf0] }
  0x15   :  { %v1012_v26 = vor.u32 %v1307_v23, %v1009_v24  ;;  %v991_v29 = vld [vmem:[#allocation4 + $0xd0] sm:$0xf]  ;;  %349 = vmatpush.bf16.msra.mxu0 %v936_v16  ;;  %v928_v30 = vor.u32 %v1288_v28, %v927_v27  ;;  %v1304_v31 = vld [vmem:[#allocation4 + $0xd4] sm:$0xf0]  ;;  %v1287_v32 = vld [vmem:[#allocation4 + $0x54] sm:$0xf] }
  0x16   :  { %v929_v33 = vld [vmem:[#allocation4 + $0x58] sm:$0xf0]  ;;  %363 = vmatpush.bf16.msra.mxu1 %v1000_v17  ;;  %v992_v34 = vor.u32 %v1304_v31, %v991_v29  ;;  %v1305_v35 = vld [vmem:[#allocation4 + $0xe4] sm:$0xf]  ;;  %v1001_v36 = vld [vmem:[#allocation4 + $0xe8] sm:$0xf0] }
  0x17   :  { %383 = vmatpush.bf16.msra.mxu2 %v1016_v21  ;;  %v919_v37 = vld [vmem:[#allocation4 + $0x40] sm:$0xf]  ;;  %391 = vmatpush.bf16.msra.mxu3 %v940_v25  ;;  %v932_v38 = vor.u32 %v1287_v32, %v929_v33  ;;  %v1004_v39 = vor.u32 %v1305_v35, %v1001_v36  ;;  %v1286_v40 = vld [vmem:[#allocation4 + $0x44] sm:$0xf0]  ;;  %v1285_v43 = vld [vmem:[#allocation4 + $0x44] sm:$0xf] }
  0x18   :  { %v983_v41 = vld [vmem:[#allocation4 + $0xc0] sm:$0xf]  ;;  %v1302_v42 = vld [vmem:[#allocation4 + $0xc4] sm:$0xf0]  ;;  %v921_v44 = vld [vmem:[#allocation4 + $0x48] sm:$0xf0]  ;;  %v920_v46 = vor.u32 %v1286_v40, %v919_v37 }
  0x19   :  { %v1303_v45 = vld [vmem:[#allocation4 + $0xd4] sm:$0xf]  ;;  %350 = vmatpush.bf16.msra.mxu0 %v928_v30  ;;  %v993_v47 = vld [vmem:[#allocation4 + $0xd8] sm:$0xf0]  ;;  %v911_v48 = vld [vmem:[#allocation4 + $0x30] sm:$0xf]  ;;  %v984_v49 = vor.u32 %v1302_v42, %v983_v41  ;;  %v924_v53 = vor.u32 %v1285_v43, %v921_v44 }
  0x1a   :  { %364 = vmatpush.bf16.msra.mxu1 %v992_v34  ;;  %v1284_v50 = vld [vmem:[#allocation4 + $0x34] sm:$0xf0]  ;;  %v975_v51 = vld [vmem:[#allocation4 + $0xb0] sm:$0xf]  ;;  %v996_v54 = vor.u32 %v1303_v45, %v993_v47  ;;  %v1283_v55 = vld [vmem:[#allocation4 + $0x34] sm:$0xf] }
  0x1b   :  { %404 = vmatpush.bf16.msrb.mxu2 %v1012_v26  ;;  %v1300_v52 = vld [vmem:[#allocation4 + $0xb4] sm:$0xf0]  ;;  %392 = vmatpush.bf16.msra.mxu3 %v932_v38  ;;  %v85_v56 = vld [vmem:[%s1528_s1 + $0x10] sm:$0xff]  ;;  %v88_v57 = vld [vmem:[%s1528_s1 + $0x28] sm:$0xff]  ;;  %vm344_vm0 = vcmask 261120   ;;  %v912_v62 = vor.u32 %v1284_v50, %v911_v48 }
  0x1c   :  { %v913_v58 = vld [vmem:[#allocation4 + $0x38] sm:$0xf0]  ;;  %v1480_v59 = vpack.c.bf16 %v88_v57, %v85_v56  ;;  %v1301_v60 = vld [vmem:[#allocation4 + $0xc4] sm:$0xf]  ;;  %v985_v61 = vld [vmem:[#allocation4 + $0xc8] sm:$0xf0]  ;;  %v976_v63 = vor.u32 %v1300_v52, %v975_v51 }
  0x1d   :  { %351 = vmatpush.bf16.msra.mxu0 %v920_v46  ;;  %v903_v0 = vld [vmem:[#allocation4 + $0x20] sm:$0xf]  ;;  %v1282_v1 = vld [vmem:[#allocation4 + $0x24] sm:$0xf0]  ;;  %v916_v2 = vor.u32 %v1283_v55, %v913_v58  ;;  %v988_v3 = vor.u32 %v1301_v60, %v985_v61  ;;  %v1281_v6 = vld [vmem:[#allocation4 + $0x24] sm:$0xf] }
  0x1e   :  { %365 = vmatpush.bf16.msra.mxu1 %v984_v49  ;;  %1029 = vmatmul.msk.bf16.vlgmr.msra.gmra.mxu2 %vm344_vm0, %v1480_v59  ;;  %v967_v4 = vld [vmem:[#allocation4 + $0xa0] sm:$0xf]  ;;  %v1298_v5 = vld [vmem:[#allocation4 + $0xa4] sm:$0xf0]  ;;  %v905_v7 = vld [vmem:[#allocation4 + $0x28] sm:$0xf0]  ;;  %v904_v10 = vor.u32 %v1282_v1, %v903_v0 }
  0x1f   :  { %405 = vmatpush.bf16.msrb.mxu2 %v1004_v39  ;;  %393 = vmatpush.bf16.msra.mxu3 %v924_v53  ;;  %v1299_v8 = vld [vmem:[#allocation4 + $0xb4] sm:$0xf]  ;;  %v977_v9 = vld [vmem:[#allocation4 + $0xb8] sm:$0xf0]  ;;  %v968_v11 = vor.u32 %v1298_v5, %v967_v4  ;;  %v895_v12 = vld [vmem:[#allocation4 + $0x10] sm:$0xf]  ;;  %v908_v14 = vor.u32 %v1281_v6, %v905_v7 }
  0x20   :  { %v1280_v13 = vld [vmem:[#allocation4 + $0x14] sm:$0xf0]  ;;  %v980_v15 = vor.u32 %v1299_v8, %v977_v9  ;;  %v959_v16 = vld [vmem:[#allocation4 + $0x90] sm:$0xf]  ;;  %v1279_v18 = vld [vmem:[#allocation4 + $0x14] sm:$0xf] }
  0x21   :  { %352 = vmatpush.bf16.msra.mxu0 %v912_v62  ;;  %v1296_v17 = vld [vmem:[#allocation4 + $0x94] sm:$0xf0]  ;;  %v897_v19 = vld [vmem:[#allocation4 + $0x18] sm:$0xf0]  ;;  %v1297_v20 = vld [vmem:[#allocation4 + $0xa4] sm:$0xf]  ;;  %v896_v22 = vor.u32 %v1280_v13, %v895_v12 }
  0x22   :  { %366 = vmatpush.bf16.msra.mxu1 %v976_v63  ;;  %v969_v21 = vld [vmem:[#allocation4 + $0xa8] sm:$0xf0]  ;;  %v887_v23 = vld [vmem:[#allocation4] sm:$0xf]  ;;  %v1278_v24 = vld [vmem:[#allocation4 + $0x4] sm:$0xf0]  ;;  %v960_v26 = vor.u32 %v1296_v17, %v959_v16  ;;  %v900_v30 = vor.u32 %v1279_v18, %v897_v19 }
  0x23   :  { %406 = vmatpush.bf16.msrb.mxu2 %v996_v54  ;;  %394 = vmatpush.bf16.msra.mxu3 %v916_v2  ;;  %v951_v25 = vld [vmem:[#allocation4 + $0x80] sm:$0xf]  ;;  %v1294_v27 = vld [vmem:[#allocation4 + $0x84] sm:$0xf0]  ;;  %v1277_v28 = vld [vmem:[#allocation4 + $0x4] sm:$0xf]  ;;  %v972_v31 = vor.u32 %v1297_v20, %v969_v21  ;;  %v888_v38 = vor.u32 %v1278_v24, %v887_v23 }
  0x24   :  { %v889_v29 = vld [vmem:[#allocation4 + $0x8] sm:$0xf0]  ;;  %v1295_v32 = vld [vmem:[#allocation4 + $0x94] sm:$0xf]  ;;  %v1091_v34 = vld [vmem:[#allocation2 + $0x78] sm:$0xf0]  ;;  %v952_v42 = vor.u32 %v1294_v27, %v951_v25 }
  0x25   :  { %353 = vmatpush.bf16.msra.mxu0 %v904_v10  ;;  %v1255_v33 = vld [vmem:[#allocation2 + $0x74] sm:$0xf]  ;;  %v961_v35 = vld [vmem:[#allocation4 + $0x98] sm:$0xf0]  ;;  %v1153_v39 = vld [vmem:[#allocation2 + $0xf0] sm:$0xf]  ;;  %v892_v47 = vor.u32 %v1277_v28, %v889_v29 }
  0x26   :  { %367 = vmatpush.bf16.msra.mxu1 %v968_v11  ;;  %v1311_v36 = vld [vmem:[#allocation4 + $0x114] sm:$0xf]  ;;  %v1025_v37 = vld [vmem:[#allocation4 + $0x118] sm:$0xf0]  ;;  %v1272_v40 = vld [vmem:[#allocation2 + $0xf4] sm:$0xf0]  ;;  %v1094_v43 = vor.u32 %v1255_v33, %v1091_v34  ;;  %v964_v48 = vor.u32 %v1295_v32, %v961_v35 }
  0x27   :  { %407 = vmatpush.bf16.msrb.mxu2 %v988_v3  ;;  %395 = vmatpush.bf16.msra.mxu3 %v908_v14  ;;  %v83_v41 = vld [vmem:[%s1528_s1] sm:$0xff]  ;;  %v86_v44 = vld [vmem:[%s1528_s1 + $0x18] sm:$0xff]  ;;  %v84_v45 = vld [vmem:[%s1528_s1 + $0x8] sm:$0xff]  ;;  %v1028_v52 = vor.u32 %v1311_v36, %v1025_v37  ;;  %v1154_v53 = vor.u32 %v1272_v40, %v1153_v39 }
  0x28   :  { %v87_v46 = vld [vmem:[%s1528_s1 + $0x20] sm:$0xff]  ;;  %v1083_v51 = vld [vmem:[#allocation2 + $0x68] sm:$0xf0]  ;;  %v89_v57 = vpack.c.bf16 %v86_v44, %v83_v41  ;;  %v1270_v61 = vld [vmem:[#allocation2 + $0xe4] sm:$0xf0] }
  0x29   :  { %354 = vmatpush.bf16.msra.mxu0 %v896_v22  ;;  %v1293_v49 = vld [vmem:[#allocation4 + $0x84] sm:$0xf]  ;;  %v953_v54 = vld [vmem:[#allocation4 + $0x88] sm:$0xf0]  ;;  %v90_v58 = vpack.c.bf16 %v87_v46, %v84_v45  ;;  %v1145_v60 = vld [vmem:[#allocation2 + $0xe0] sm:$0xf] }
  0x2a   :  { %368 = vmatpush.bf16.msra.mxu1 %v960_v26  ;;  %v1253_v50 = vld [vmem:[#allocation2 + $0x64] sm:$0xf]  ;;  %v1017_v56 = vld [vmem:[#allocation4 + $0x108] sm:$0xf0]  ;;  %v1089_v62 = vld [vmem:[#allocation2 + $0x70] sm:$0xf]  ;;  %v956_v3 = vor.u32 %v1293_v49, %v953_v54  ;;  %v1146_v7 = vor.u32 %v1270_v61, %v1145_v60 }
  0x2b   :  { %408 = vmatpush.bf16.msrb.mxu2 %v980_v15  ;;  %396 = vmatpush.bf16.msra.mxu3 %v900_v30  ;;  %v1309_v55 = vld [vmem:[#allocation4 + $0x104] sm:$0xf]  ;;  %v1086_v63 = vor.u32 %v1253_v50, %v1083_v51  ;;  %v1256_v0 = vld [vmem:[#allocation2 + $0x74] sm:$0xf0]  ;;  %v1169_v1 = vld [vmem:[#allocation2 + $0x110] sm:$0xf] }
  0x2c   :  { %v1276_v2 = vld [vmem:[#allocation2 + $0x114] sm:$0xf0]  ;;  %v1251_v4 = vld [vmem:[#allocation2 + $0x54] sm:$0xf]  ;;  %v1075_v5 = vld [vmem:[#allocation2 + $0x58] sm:$0xf0]  ;;  %v1020_v6 = vor.u32 %v1309_v55, %v1017_v56  ;;  %v1090_v9 = vor.u32 %v1256_v0, %v1089_v62 }
  0x2d   :  { %355 = vmatpush.bf16.msra.mxu0 %v888_v38  ;;  %v1137_v8 = vld [vmem:[#allocation2 + $0xd0] sm:$0xf]  ;;  %v1170_v10 = vor.u32 %v1276_v2, %v1169_v1  ;;  %v1268_v11 = vld [vmem:[#allocation2 + $0xd4] sm:$0xf0]  ;;  %v1081_v12 = vld [vmem:[#allocation2 + $0x60] sm:$0xf]  ;;  %v1078_v14 = vor.u32 %v1251_v4, %v1075_v5 }
  0x2e   :  { %369 = vmatpush.bf16.msra.mxu1 %v952_v42  ;;  %v1254_v13 = vld [vmem:[#allocation2 + $0x64] sm:$0xf0]  ;;  %v1161_v15 = vld [vmem:[#allocation2 + $0x100] sm:$0xf]  ;;  %v1271_v17 = vld [vmem:[#allocation2 + $0xf4] sm:$0xf]  ;;  %v1138_v21 = vor.u32 %v1268_v11, %v1137_v8 }
  0x2f   :  { %409 = vmatpush.bf16.msrb.mxu2 %v972_v31  ;;  %397 = vmatpush.bf16.msra.mxu3 %v892_v47  ;;  %v1274_v16 = vld [vmem:[#allocation2 + $0x104] sm:$0xf0]  ;;  %v1155_v18 = vld [vmem:[#allocation2 + $0xf8] sm:$0xf0]  ;;  %v1249_v19 = vld [vmem:[#allocation2 + $0x44] sm:$0xf]  ;;  %v1082_v22 = vor.u32 %v1254_v13, %v1081_v12 }
  0x30   :  { %356 = vmatmul.bf16.vlgmr.msra.gmra.mxu0 %v89_v57  ;;  %v1067_v20 = vld [vmem:[#allocation2 + $0x48] sm:$0xf0]  ;;  %v1162_v23 = vor.u32 %v1274_v16, %v1161_v15  ;;  %v1129_v24 = vld [vmem:[#allocation2 + $0xc0] sm:$0xf]  ;;  %v1266_v25 = vld [vmem:[#allocation2 + $0xc4] sm:$0xf0]  ;;  %v1158_v26 = vor.u32 %v1271_v17, %v1155_v18 }
  0x31   :  { %657 = vmatpush.bf16.msrb.mxu0 %v1094_v43  ;;  %370 = vmatmul.bf16.vlgmr.msra.gmra.mxu1 %v90_v58  ;;  %v1070_v27 = vor.u32 %v1249_v19, %v1067_v20  ;;  %v1073_v28 = vld [vmem:[#allocation2 + $0x50] sm:$0xf]  ;;  %v1252_v29 = vld [vmem:[#allocation2 + $0x54] sm:$0xf0]  ;;  %v1269_v30 = vld [vmem:[#allocation2 + $0xe4] sm:$0xf]  ;;  %v1130_v34 = vor.u32 %v1266_v25, %v1129_v24 }
  0x32   :  { %424 = vmatpush.bf16.msrb.mxu1 %v1028_v52  ;;  %398 = vmatmul.bf16.vlgmr.msra.gmra.mxu3 %v89_v57  ;;  %v1147_v31 = vld [vmem:[#allocation2 + $0xe8] sm:$0xf0]  ;;  %v1247_v32 = vld [vmem:[#allocation2 + $0x34] sm:$0xf]  ;;  %v1059_v33 = vld [vmem:[#allocation2 + $0x38] sm:$0xf0]  ;;  %v1074_v35 = vor.u32 %v1252_v29, %v1073_v28 }
  0x33   :  { %410 = vmatpush.bf16.msrb.mxu2 %v964_v48  ;;  %629 = vmatpush.bf16.msrb.mxu3 %v1154_v53  ;;  %v1121_v36 = vld [vmem:[#allocation2 + $0xb0] sm:$0xf]  ;;  %v1264_v37 = vld [vmem:[#allocation2 + $0xb4] sm:$0xf0]  ;;  %v1150_v38 = vor.u32 %v1269_v30, %v1147_v31  ;;  %v1062_v39 = vor.u32 %v1247_v32, %v1059_v33  ;;  %v1065_v40 = vld [vmem:[#allocation2 + $0x40] sm:$0xf] }
  0x34   :  { %v1250_v41 = vld [vmem:[#allocation2 + $0x44] sm:$0xf0]  ;;  %v1267_v42 = vld [vmem:[#allocation2 + $0xd4] sm:$0xf]  ;;  %v1139_v43 = vld [vmem:[#allocation2 + $0xd8] sm:$0xf0]  ;;  %v1122_v44 = vor.u32 %v1264_v37, %v1121_v36 }
  0x35   :  { %658 = vmatpush.bf16.msrb.mxu0 %v1086_v63  ;;  %v1245_v45 = vld [vmem:[#allocation2 + $0x24] sm:$0xf]  ;;  %v1051_v46 = vld [vmem:[#allocation2 + $0x28] sm:$0xf0]  ;;  %v1066_v47 = vor.u32 %v1250_v41, %v1065_v40  ;;  %v1113_v48 = vld [vmem:[#allocation2 + $0xa0] sm:$0xf]  ;;  %v1142_v50 = vor.u32 %v1267_v42, %v1139_v43 }
  0x36   :  { %425 = vmatpush.bf16.msrb.mxu1 %v1020_v6  ;;  %v1262_v49 = vld [vmem:[#allocation2 + $0xa4] sm:$0xf0]  ;;  %v1057_v51 = vld [vmem:[#allocation2 + $0x30] sm:$0xf]  ;;  %v1248_v52 = vld [vmem:[#allocation2 + $0x34] sm:$0xf0]  ;;  %v1054_v53 = vor.u32 %v1245_v45, %v1051_v46 }
  0x37   :  { %411 = vmatpush.bf16.msrb.mxu2 %v956_v3  ;;  %630 = vmatpush.bf16.msrb.mxu3 %v1146_v7  ;;  %v1265_v54 = vld [vmem:[#allocation2 + $0xc4] sm:$0xf]  ;;  %v1131_v55 = vld [vmem:[#allocation2 + $0xc8] sm:$0xf0]  ;;  %v76_v56 = vld [vmem:[%s1527_s0 + $0x10] sm:$0xff]  ;;  %v1114_v57 = vor.u32 %v1262_v49, %v1113_v48  ;;  %v1058_v62 = vor.u32 %v1248_v52, %v1057_v51 }
  0x38   :  { %v1243_v60 = vld [vmem:[#allocation2 + $0x14] sm:$0xf]  ;;  %v1043_v61 = vld [vmem:[#allocation2 + $0x18] sm:$0xf0]  ;;  %v1105_v63 = vld [vmem:[#allocation2 + $0x90] sm:$0xf]  ;;  %v1134_v1 = vor.u32 %v1265_v54, %v1131_v55 }
  0x39   :  { %659 = vmatpush.bf16.msrb.mxu0 %v1078_v14  ;;  %v1260_v0 = vld [vmem:[#allocation2 + $0x94] sm:$0xf0]  ;;  %v1049_v2 = vld [vmem:[#allocation2 + $0x20] sm:$0xf]  ;;  %v1246_v3 = vld [vmem:[#allocation2 + $0x24] sm:$0xf0]  ;;  %v1046_v5 = vor.u32 %v1243_v60, %v1043_v61 }
  0x3a   :  { %615 = vmatpush.bf16.msra.mxu1 %v1090_v9  ;;  %412 = vmatmul.bf16.vlgmr.msrb.gmra.mxu2 %v90_v58  ;;  %v79_v58 = vld [vmem:[%s1527_s0 + $0x28] sm:$0xff]  ;;  %v1263_v6 = vld [vmem:[#allocation2 + $0xb4] sm:$0xf]  ;;  %v1123_v7 = vld [vmem:[#allocation2 + $0xb8] sm:$0xf0]  ;;  %v1106_v8 = vor.u32 %v1260_v0, %v1105_v63  ;;  %v1050_v11 = vor.u32 %v1246_v3, %v1049_v2 }
  0x3b   :  { %649 = vmatpush.bf16.msra.mxu2 %v1170_v10  ;;  %631 = vmatpush.bf16.msrb.mxu3 %v1138_v21  ;;  %v82_v4 = vpack.c.bf16 %v79_v58, %v76_v56  ;;  %v1241_v9 = vld [vmem:[#allocation2 + $0x4] sm:$0xf]  ;;  %v1035_v10 = vld [vmem:[#allocation2 + $0x8] sm:$0xf0]  ;;  %v1097_v12 = vld [vmem:[#allocation2 + $0x80] sm:$0xf]  ;;  %v1126_v14 = vor.u32 %v1263_v6, %v1123_v7 }
  0x3c   :  { %v1258_v13 = vld [vmem:[#allocation2 + $0x84] sm:$0xf0]  ;;  %v1244_v15 = vld [vmem:[#allocation2 + $0x14] sm:$0xf0]  ;;  %v1261_v16 = vld [vmem:[#allocation2 + $0xa4] sm:$0xf]  ;;  %v1038_v17 = vor.u32 %v1241_v9, %v1035_v10 }
  0x3d   :  { %660 = vmatpush.bf16.msrb.mxu0 %v1070_v27  ;;  %v1115_v18 = vld [vmem:[#allocation2 + $0xa8] sm:$0xf0]  ;;  %v74_v19 = vld [vmem:[%s1527_s0] sm:$0xff]  ;;  %v77_v20 = vld [vmem:[%s1527_s0 + $0x18] sm:$0xff]  ;;  %v1098_v21 = vor.u32 %v1258_v13, %v1097_v12 }
  0x3e   :  { %616 = vmatpush.bf16.msra.mxu1 %v1082_v22  ;;  %v75_v22 = vld [vmem:[%s1527_s0 + $0x8] sm:$0xff]  ;;  %v1118_v25 = vor.u32 %v1261_v16, %v1115_v18  ;;  %v1033_v27 = vld [vmem:[#allocation2] sm:$0xf]  ;;  %v1259_v29 = vld [vmem:[#allocation2 + $0x94] sm:$0xf] }
  0x3f   :  { %650 = vmatpush.bf16.msra.mxu2 %v1162_v23  ;;  %632 = vmatpush.bf16.msrb.mxu3 %v1130_v34  ;;  %v78_v23 = vld [vmem:[%s1527_s0 + $0x20] sm:$0xff]  ;;  %v1242_v28 = vld [vmem:[#allocation2 + $0x4] sm:$0xf0]  ;;  %v1107_v31 = vld [vmem:[#allocation2 + $0x98] sm:$0xf0] }
  0x40   :  { %v81_v30 = vpack.c.bf16 %v78_v23, %v75_v22  ;;  %v1275_v32 = vld [vmem:[#allocation2 + $0x114] sm:$0xf]  ;;  %v1171_v33 = vld [vmem:[#allocation2 + $0x118] sm:$0xf0]  ;;  %v1034_v34 = vor.u32 %v1242_v28, %v1033_v27  ;;  %v1257_v37 = vld [vmem:[#allocation2 + $0x84] sm:$0xf] }
  0x41   :  { %661 = vmatpush.bf16.msrb.mxu0 %v1062_v39  ;;  %1030 = vmatmul.msk.bf16.vlgmr.msrb.gmra.mxu1 %vm344_vm0, %v1480_v59  ;;  %v1041_v59 = vld [vmem:[#allocation2 + $0x10] sm:$0xf]  ;;  %v1174_v36 = vor.u32 %v1275_v32, %v1171_v33  ;;  %v1273_v39 = vld [vmem:[#allocation2 + $0x104] sm:$0xf]  ;;  %v1163_v40 = vld [vmem:[#allocation2 + $0x108] sm:$0xf0] }
  0x42   :  { %617 = vmatpush.bf16.msra.mxu1 %v1074_v35  ;;  %v1042_v24 = vor.u32 %v1244_v15, %v1041_v59  ;;  %v1110_v35 = vor.u32 %v1259_v29, %v1107_v31  ;;  %v1166_v42 = vor.u32 %v1273_v39, %v1163_v40  ;;  %v1320_v43 = vld [vmem:[#allocation6 + $0x38] sm:$0xff]  ;;  %v1319_v45 = vld [vmem:[#allocation6 + $0x30] sm:$0xff]  ;;  %v1318_v46 = vld [vmem:[#allocation6 + $0x28] sm:$0xff] }
  0x43   :  { %671 = vmatpush.bf16.msrb.mxu2 %v1158_v26  ;;  %633 = vmatpush.bf16.msrb.mxu3 %v1122_v44  ;;  %v80_v26 = vpack.c.bf16 %v77_v20, %v74_v19  ;;  %v1317_v49 = vld [vmem:[#allocation6 + $0x20] sm:$0xff]  ;;  %v1316_v51 = vld [vmem:[#allocation6 + $0x18] sm:$0xff]  ;;  %v1327_v52 = vld [vmem:[#allocation6 + $0x70] sm:$0xff] }
  0x44   :  { %v1315_v55 = vld [vmem:[#allocation6 + $0x10] sm:$0xff]  ;;  %v1326_v56 = vld [vmem:[#allocation6 + $0x68] sm:$0xff]  ;;  %v1325_v58 = vld [vmem:[#allocation6 + $0x60] sm:$0xff] }
  0x45   :  { %662 = vmatpush.bf16.msrb.mxu0 %v1054_v53  ;;  %v1313_v63 = vld [vmem:[#allocation6] sm:$0xff]  ;;  %v1324_v0 = vld [vmem:[#allocation6 + $0x58] sm:$0xff] }
  0x46   :  { %618 = vmatpush.bf16.msra.mxu1 %v1066_v47  ;;  %v699_v16 = vld [vmem:[%s1531_s4] sm:$0x3] }
  0x47   :  { %672 = vmatpush.bf16.msrb.mxu2 %v1150_v38  ;;  %634 = vmatpush.bf16.msrb.mxu3 %v1114_v57  ;;  %v1099_v38 = vld [vmem:[#allocation2 + $0x88] sm:$0xf0] }
  0x48   :  { %v1102_v41 = vor.u32 %v1257_v37, %v1099_v38  ;;  %v1314_v57 = vld [vmem:[#allocation6 + $0x8] sm:$0xff] }
  0x49   :  { %663 = vmatpush.bf16.msrb.mxu0 %v1046_v5 }
  0x4a   :  { %619 = vmatpush.bf16.msra.mxu1 %v1058_v62  ;;  %1175 = vmatmul.msk.bf16.vlgmr.msra.gmra.mxu2 %vm344_vm0, %v82_v4 }
  0x4b   :  { %673 = vmatpush.bf16.msrb.mxu2 %v1142_v50  ;;  %635 = vmatpush.bf16.msrb.mxu3 %v1106_v8  ;;  %v1328_v50 = vld [vmem:[#allocation6 + $0x78] sm:$0xff]  ;;  %v1321_v8 = vld [vmem:[#allocation6 + $0x40] sm:$0xff] }
  0x4d   :  { %664 = vmatpush.bf16.msrb.mxu0 %v1038_v17 }
  0x4e   :  { %620 = vmatpush.bf16.msra.mxu1 %v1050_v11 }
  0x4f   :  { %674 = vmatpush.bf16.msrb.mxu2 %v1134_v1  ;;  %636 = vmatpush.bf16.msrb.mxu3 %v1098_v21  ;;  %v1323_v1 = vld [vmem:[#allocation6 + $0x50] sm:$0xff]  ;;  %v701_v21 = vperm.slane %v699_v16, 0 }
  0x50   :  { %665 = vmatmul.bf16.vlgmr.msrb.gmra.mxu0 %v80_v26 }
  0x51   :  { %861 = vmatpush.bf16.msra.mxu0 %v1328_v50 }
  0x52   :  { %621 = vmatpush.bf16.msra.mxu1 %v1042_v24  ;;  %637 = vmatmul.bf16.vlgmr.msrb.gmra.mxu3 %v81_v30 }
  0x53   :  { %675 = vmatpush.bf16.msrb.mxu2 %v1126_v14  ;;  %847 = vmatpush.bf16.msra.mxu3 %v1320_v43  ;;  %v702_v43 = vperm.slane %v699_v16, 1 }
  0x55   :  { %862 = vmatpush.bf16.msra.mxu0 %v1327_v52 }
  0x56   :  { %622 = vmatpush.bf16.msra.mxu1 %v1034_v34 }
  0x57   :  { %676 = vmatpush.bf16.msrb.mxu2 %v1118_v25  ;;  %848 = vmatpush.bf16.msra.mxu3 %v1319_v45 }
  0x59   :  { %623 = vmatmul.bf16.vlgmr.msra.gmra.mxu1 %v80_v26  ;;  %863 = vmatpush.bf16.msra.mxu0 %v1326_v56 }
  0x5a   :  { %691 = vmatpush.bf16.msrb.mxu1 %v1174_v36 }
  0x5b   :  { %677 = vmatpush.bf16.msrb.mxu2 %v1110_v35  ;;  %849 = vmatpush.bf16.msra.mxu3 %v1318_v46 }
  0x5d   :  { %864 = vmatpush.bf16.msra.mxu0 %v1325_v58 }
  0x5e   :  { %692 = vmatpush.bf16.msrb.mxu1 %v1166_v42 }
  0x5f   :  { %678 = vmatpush.bf16.msrb.mxu2 %v1102_v41  ;;  %850 = vmatpush.bf16.msra.mxu3 %v1317_v49 }
  0x61   :  { %865 = vmatpush.bf16.msra.mxu0 %v1324_v0 }
  0x62   :  { %679 = vmatmul.bf16.vlgmr.msrb.gmra.mxu2 %v81_v30 }
  0x63   :  { %851 = vmatpush.bf16.msra.mxu3 %v1316_v51 }
  0x65   :  { %866 = vmatpush.bf16.msra.mxu0 %v1323_v1 }
  0x67   :  { %852 = vmatpush.bf16.msra.mxu3 %v1315_v55 }
  0x69   :  { %1176 = vmatmul.msk.bf16.vlgmr.msrb.gmra.mxu1 %vm344_vm0, %v82_v4  ;;  %v1322_v4 = vld [vmem:[#allocation6 + $0x48] sm:$0xff] }
  0x6a   :  { %867 = vmatpush.bf16.msra.mxu0 %v1322_v4 }
  0x6b   :  { %853 = vmatpush.bf16.msra.mxu3 %v1314_v57 }
  0x6e   :  { %868 = vmatpush.bf16.msra.mxu0 %v1321_v8 }
  0x6f   :  { %854 = vmatpush.bf16.msra.mxu3 %v1313_v63 }
  0xa1   :  { %v385_v44 = vpop.f32.mrf.mxu2 }
  0xa9   :  { %v387_v48 = vpop.f32.mrf.mxu2 }
  0xad   :  { %v357_v2 = vpop.f32.mrf.mxu0 }
  0xae   :  { %v371_v47 = vpop.f32.mrf.mxu1 }
  0xaf   :  { %v372_v7 = vadd.f32 %v371_v47, %v357_v2 }
  0xb1   :  { %v386_v9 = vadd.f32 %v385_v44, %v372_v7 }
  0xb5   :  { %v399_v61 = vpop.f32.mrf.mxu3  ;;  %v359_v10 = vpop.f32.mrf.mxu0 }
  0xb6   :  { %v373_v53 = vpop.f32.mrf.mxu1 }
  0xb7   :  { %v374_v14 = vadd.f32 %v373_v53, %v359_v10 }
  0xb9   :  { %v388_v17 = vadd.f32 %v387_v48, %v374_v14 }
  0xbd   :  { %v413_v54 = vpop.f32.mrf.mxu2  ;;  %v401_v5 = vpop.f32.mrf.mxu3 }
  0xbe   :  { %v427_v60 = vpop.f32.mrf.mxu1  ;;  %v414_v24 = vadd.f32 %v413_v54, %v399_v61  ;;  %v1341_v54 = vld [vmem:[%s1533_s6] ss:$0 sm:$0xff] }
  0xc0   :  { %v428_v29 = vadd.f32 %v427_v60, %v414_v24 }
  0xc5   :  { %v415_v62 = vpop.f32.mrf.mxu2 }
  0xc6   :  { %v429_v3 = vpop.f32.mrf.mxu1  ;;  %v416_v32 = vadd.f32 %v415_v62, %v401_v5 }
  0xc8   :  { %v430_v37 = vadd.f32 %v429_v3, %v416_v32 }
  0xcd   :  { %v652_v6 = vpop.f32.mrf.mxu2  ;;  %v666_v18 = vpop.f32.mrf.mxu0 }
  0xce   :  { %v667_v33 = vadd.f32 %v666_v18, %v428_v29 }
  0xd5   :  { %v638_v13 = vpop.f32.mrf.mxu3  ;;  %v654_v59 = vpop.f32.mrf.mxu2 }
  0xd6   :  { %v624_v11 = vpop.f32.mrf.mxu1  ;;  %v668_v36 = vpop.f32.mrf.mxu0 }
  0xd7   :  { %v625_v12 = vadd.f32 %v624_v11, %v386_v9  ;;  %v669_v41 = vadd.f32 %v668_v36, %v430_v37 }
  0xd9   :  { %v639_v15 = vadd.f32 %v638_v13, %v625_v12 }
  0xdb   :  { %v653_v20 = vadd.f32 %v652_v6, %v639_v15 }
  0xdd   :  { %v640_v23 = vpop.f32.mrf.mxu3  ;;  %v705_v27 = vadd.f32 %v701_v21, %v653_v20 }
  0xde   :  { %v626_v19 = vpop.f32.mrf.mxu1 }
  0xdf   :  { %v627_v22 = vadd.f32 %v626_v19, %v388_v17  ;;  %v709_v34 = vmax.f32 %v705_v27, 0.0 }
  0xe1   :  { %v641_v25 = vadd.f32 %v640_v23, %v627_v22 }
  0xe3   :  { %v655_v28 = vadd.f32 %v654_v59, %v641_v25 }
  0xe5   :  { %v680_v26 = vpop.f32.mrf.mxu2  ;;  %v707_v30 = vadd.f32 %v701_v21, %v655_v28 }
  0xe6   :  { %v694_v31 = vpop.f32.mrf.mxu1  ;;  %v681_v39 = vadd.f32 %v680_v26, %v667_v33 }
  0xe7   :  { %v711_v35 = vmax.f32 %v707_v30, 0.0 }
  0xe8   :  { %v695_v42 = vadd.f32 %v694_v31, %v681_v39 }
  0xe9   :  { %v713_v38 = vpack.c.bf16 %v711_v35, %v709_v34 }
  0xea   :  { %v706_v46 = vadd.f32 %v702_v43, %v695_v42 }
  0xeb   :  { %855 = vmatmul.bf16.vlgmr.msra.gmra.mxu3 %v713_v38 }
  0xec   :  { %v710_v49 = vmax.f32 %v706_v46, 0.0 }
  0xed   :  { %v682_v40 = vpop.f32.mrf.mxu2 }
  0xee   :  { %v683_v44 = vadd.f32 %v682_v40, %v669_v41  ;;  %v696_v45 = vpop.f32.mrf.mxu1 }
  0xf0   :  { %v697_v47 = vadd.f32 %v696_v45, %v683_v44 }
  0xf2   :  { %v708_v48 = vadd.f32 %v702_v43, %v697_v47 }
  0xf4   :  { %v712_v50 = vmax.f32 %v708_v48, 0.0 }
  0xf6   :  { %v714_v51 = vpack.c.bf16 %v712_v50, %v710_v49 }
  0xf8   :  { %869 = vmatmul.bf16.vlgmr.msra.gmra.mxu0 %v714_v51 }
 0x16e   :  { %v856_v52 = vpop.f32.mrf.mxu3 }
 0x16f   :  { %v857_v56 = vadd.f32 %v1341_v54, %v856_v52 }
 0x175   :  { %v870_v53 = vpop.f32.mrf.mxu0 }
 0x176   :  { %v858_v55 = vpop.f32.mrf.mxu3  ;;  %v871_v60 = vadd.f32 %v870_v53, %v857_v56 }
 0x177   :  { %v859_v57 = vadd.f32 %v1341_v54, %v858_v55 }
 0x17d   :  { %v872_v58 = vpop.f32.mrf.mxu0 }
 0x17e   :  { %v873_v61 = vadd.f32 %v872_v58, %v859_v57 }
 0x180   :  { %v1332_v62 = vpack.c.bf16 %v873_v61, %v871_v60 }
 0x182   :  { %1333 = vst [vmem:[%s1534_s7] sm:$0xff] %v1332_v62  }
 0x183   :  { %883 = vsyncpa [#allocation3], 1 }
 0x184   :  { %884 = vsyncpa [#allocation5], 1 }

</bundles_post_ra>
